<compile_context>
chip_gen: v7x
topology: tpu7x:2x2x1
jax: 0.10.0
libtpu: 0.0.40
codegen_flags: <defaults>
</compile_context>

<pallas_src>
import jax
import jax.numpy as jnp
from jax.experimental import pallas as pl
from jax.experimental.pallas import tpu as pltpu


def _round_up(x, m):
    return ((x + m - 1) // m) * m


# ---------------------------------------------------------------------------
# Stage 1: per-relation projection  HW[r] = H @ W[r]
# ---------------------------------------------------------------------------
def _proj_kernel(h_ref, w_ref, hw_ref):
    hw_ref[...] = jnp.dot(
        h_ref[...], w_ref[...], preferred_element_type=jnp.float32
    ).astype(hw_ref.dtype)


# ---------------------------------------------------------------------------
# Stage 2: relation-summed aggregation  out = tanh( sum_{r,k} A @ HW + bias )
# ---------------------------------------------------------------------------
def _agg_kernel(nz_ref, a_ref, hw_ref, b_ref, o_ref):
    i = pl.program_id(0)       # dst tile
    r = pl.program_id(1)       # relation
    k = pl.program_id(2)       # src tile
    n_r = pl.num_programs(1)
    n_k = pl.num_programs(2)

    @pl.when((r == 0) & (k == 0))
    def _():
        o_ref[...] = jnp.zeros_like(o_ref)

    # Skip all-zero adjacency blocks (graph sparsity).
    flat = (i * n_r + r) * n_k + k

    @pl.when(nz_ref[flat] != 0)
    def _():
        o_ref[...] += jnp.dot(
            a_ref[...], hw_ref[...], preferred_element_type=jnp.float32
        )

    @pl.when((r == n_r - 1) & (k == n_k - 1))
    def _():
        o_ref[...] = jnp.tanh(o_ref[...] + b_ref[...])


def rgcn_layer_pallas(h, weight, adj, bias):
    """h: (N, in_feat), weight: (R, in_feat, out_feat),
    adj: (R, N, N) with adj[r, dst, src] = norm, bias: (1, out_feat)."""
    n_nodes, in_feat = h.shape
    num_rels, _, out_feat = weight.shape

    # --- tile sizing / padding -------------------------------------------
    if n_nodes <= 512:
        n_pad = _round_up(n_nodes, 8)
        tm = n_pad            # dst-row tile
        tk = n_pad            # src-col tile (full dim -> legal even if <128)
    else:
        tm = 256
        tk = 512
        n_pad = _round_up(n_nodes, 512)
    f_pad = _round_up(out_feat, 128)   # lane-dense output features

    m_tiles = n_pad // tm
    k_tiles = n_pad // tk

    # --- pad + cast (bf16 MXU inputs, f32 accumulation/bias) --------------
    h_p = jnp.zeros((n_pad, in_feat), jnp.float32).at[:n_nodes].set(h)
    w_p = jnp.zeros((num_rels, in_feat, f_pad), jnp.float32).at[:, :, :out_feat].set(weight)
    adj_p = jnp.zeros((num_rels, n_pad, n_pad), jnp.float32).at[:, :n_nodes, :n_nodes].set(adj)
    b_p = jnp.zeros((1, f_pad), jnp.float32).at[:, :out_feat].set(bias.astype(jnp.float32))

    h_bf = h_p.astype(jnp.bfloat16)
    w_bf = w_p.astype(jnp.bfloat16)
    adj_bf = adj_p.astype(jnp.bfloat16)

    # --- stage 1: HW[r] = H @ W[r] (computed once, streamed to stage 2) ---
    hw = pl.pallas_call(
        _proj_kernel,
        out_shape=jax.ShapeDtypeStruct((num_rels, n_pad, f_pad), jnp.bfloat16),
        grid_spec=pltpu.PrefetchScalarGridSpec(
            num_scalar_prefetch=0,
            grid=(num_rels, m_tiles),
            in_specs=[
                pl.BlockSpec((tm, in_feat), lambda r, m: (m, 0)),
                pl.BlockSpec((None, in_feat, f_pad), lambda r, m: (r, 0, 0)),
            ],
            out_specs=pl.BlockSpec((None, tm, f_pad), lambda r, m: (r, m, 0)),
        ),
        compiler_params=pltpu.CompilerParams(
            dimension_semantics=("parallel", "parallel")),
    )(h_bf, w_bf)

    # --- nonzero-block table (scalar prefetch -> SMEM) --------------------
    adj_blk = adj_p.reshape(num_rels, m_tiles, tm, k_tiles, tk)
    nz = jnp.sum(jnp.abs(adj_blk), axis=(2, 4)) > 0.0          # (R, m_tiles, k_tiles)
    nz = jnp.transpose(nz, (1, 0, 2)).astype(jnp.int32).reshape(-1)

    # --- stage 2: out = tanh( sum_{r,k} A @ HW + bias ) -------------------
    out_pad = pl.pallas_call(
        _agg_kernel,
        out_shape=jax.ShapeDtypeStruct((n_pad, f_pad), jnp.float32),
        grid_spec=pltpu.PrefetchScalarGridSpec(
            num_scalar_prefetch=1,
            grid=(m_tiles, num_rels, k_tiles),
            in_specs=[
                pl.BlockSpec((None, tm, tk), lambda i, r, k, nz_ref: (r, i, k)),
                pl.BlockSpec((None, tk, f_pad), lambda i, r, k, nz_ref: (r, k, 0)),
                pl.BlockSpec((1, f_pad), lambda i, r, k, nz_ref: (0, 0)),
            ],
            out_specs=pl.BlockSpec((tm, f_pad), lambda i, r, k, nz_ref: (i, 0)),
        ),
        compiler_params=pltpu.CompilerParams(
            dimension_semantics=("parallel", "arbitrary", "arbitrary")),
    )(nz, adj_bf, hw, b_p)

    return out_pad[:n_nodes, :out_feat]


# ---------------------------------------------------------------------------
# Glue + reference
# ---------------------------------------------------------------------------
def build_relation_adjacency(src, dst, rel_type, norm, num_rels, num_nodes):
    """Dense A[r, v, u] = sum of norm over edges u->v with relation r (glue)."""
    adj = jnp.zeros((num_rels, num_nodes, num_nodes), dtype=jnp.float32)
    adj = adj.at[rel_type, dst, src].add(norm)
    return adj


def rgcn_reference(h, weight, src, dst, rel_type, norm, bias, num_nodes):
    """Pure-JAX edge-wise reference mirroring message_func/apply_func (f32)."""
    w = weight[rel_type]                         # (E, in_feat, out_feat)
    hh = h[src][:, None, :]                      # (E, 1, in_feat)
    msg = jnp.einsum("eif,efo->eio", hh, w)      # (E, 1, out_feat)
    msg = (msg * norm[:, None, None]).reshape(src.shape[0], -1)
    agg = jnp.zeros((num_nodes, weight.shape[-1]), jnp.float32).at[dst].add(msg)
    return jnp.tanh(agg + bias)


if __name__ == "__main__":
    key = jax.random.PRNGKey(0)

    num_nodes = 50      # exercises node padding (-> 56)
    in_feat = 32
    out_feat = 48       # exercises lane padding (-> 128)
    num_rels = 3
    num_edges = 150

    k_h, k_w, k_b, k_s, k_d, k_r, k_n = jax.random.split(key, 7)

    # Deterministic synthetic parameter init (xavier_uniform with relu gain).
    gain = jnp.sqrt(2.0)
    w_bound = gain * jnp.sqrt(6.0 / (in_feat + out_feat))
    weight = jax.random.uniform(
        k_w, (num_rels, in_feat, out_feat), jnp.float32, -w_bound, w_bound)
    b_bound = gain * jnp.sqrt(6.0 / (1 + out_feat))
    bias = jax.random.uniform(k_b, (1, out_feat), jnp.float32, -b_bound, b_bound)

    # Node features and a synthetic edge list (src, dst, rel_type, norm).
    h = jax.random.normal(k_h, (num_nodes, in_feat), jnp.float32)
    src = jax.random.randint(k_s, (num_edges,), 0, num_nodes)
    dst = jax.random.randint(k_d, (num_edges,), 0, num_nodes)
    rel_type = jax.random.randint(k_r, (num_edges,), 0, num_rels)
    norm = jax.random.uniform(k_n, (num_edges,), jnp.float32, 0.1, 1.0)

    adj = build_relation_adjacency(src, dst, rel_type, norm, num_rels, num_nodes)

    out = rgcn_layer_pallas(h, weight, adj, bias)
    out = jax.block_until_ready(out)

    ref = rgcn_reference(h, weight, src, dst, rel_type, norm, bias, num_nodes)
    assert out.shape == (num_nodes, out_feat)
    # bf16 MXU inputs (f32 accumulation) -> loosened tolerance vs. f32 reference.
    assert jnp.allclose(out, ref, atol=5e-2, rtol=5e-2), float(
        jnp.max(jnp.abs(out - ref)))

    print("KERNEL_OK")
</pallas_src>

<mosaic_0001>
module attributes {stable_mosaic.version = 11 : i64} {
  func.func @_proj_kernel(%arg0: i32, %arg1: i32, %arg2: memref<56x32xbf16, #tpu.memory_space<vmem>>, %arg3: memref<1x32x128xbf16, #tpu.memory_space<vmem>>, %arg4: memref<1x56x128xbf16, #tpu.memory_space<vmem>>) attributes {dimension_semantics = [#tpu.dimension_semantics<parallel>, #tpu.dimension_semantics<parallel>], iteration_bounds = array<i64: 3, 1>, scalar_prefetch = 0 : i64, scratch_operands = 0 : i64, tpu.core_type = #tpu.core_type<tc>, window_params = [{transform_indices = @transform_0, window_bounds = array<i64: 56, 32>}, {transform_indices = @transform_1, window_bounds = array<i64: 1, 32, 128>}, {transform_indices = @transform_2, window_bounds = array<i64: 1, 56, 128>}]} {
    %c0 = arith.constant 0 : index
    %c0_0 = arith.constant 0 : index
    %0 = vector.load %arg2[%c0, %c0_0] : memref<56x32xbf16, #tpu.memory_space<vmem>>, vector<56x32xbf16>
    %c0_1 = arith.constant 0 : index
    %c0_2 = arith.constant 0 : index
    %c0_3 = arith.constant 0 : index
    %1 = vector.load %arg3[%c0_1, %c0_2, %c0_3] : memref<1x32x128xbf16, #tpu.memory_space<vmem>>, vector<1x32x128xbf16>
    %2 = vector.shape_cast %1 : vector<1x32x128xbf16> to vector<32x128xbf16>
    %cst = arith.constant dense<0.000000e+00> : vector<56x128xf32>
    %3 = tpu.matmul %0, %2, %cst {dimension_numbers = #tpu.dot_dimension_numbers<[1], [0], [0], [1], [0, 0, 1, 1], [], []>} : vector<56x32xbf16>, vector<32x128xbf16>, vector<56x128xf32> -> vector<56x128xf32>
    %4 = arith.truncf %3 : vector<56x128xf32> to vector<56x128xbf16>
    %c0_4 = arith.constant 0 : index
    %c0_5 = arith.constant 0 : index
    %c0_6 = arith.constant 0 : index
    %5 = vector.load %arg4[%c0_4, %c0_5, %c0_6] : memref<1x56x128xbf16, #tpu.memory_space<vmem>>, vector<1x56x128xbf16>
    %6 = vector.shape_cast %5 : vector<1x56x128xbf16> to vector<56x128xbf16>
    %7 = vector.shape_cast %4 : vector<56x128xbf16> to vector<1x56x128xbf16>
    tpu.vector_store %arg4[%c0_4, %c0_5, %c0_6], %7 {strides = array<i32>} : memref<1x56x128xbf16, #tpu.memory_space<vmem>>, vector<1x56x128xbf16>,
    return
  }
  func.func @transform_0(%arg0: i32, %arg1: i32) -> (i32, i32) {
    %c0_i32 = arith.constant 0 : i32
    %c0_i32_0 = arith.constant 0 : i32
    return %arg1, %c0_i32 : i32, i32
  }
  func.func @transform_1(%arg0: i32, %arg1: i32) -> (i32, i32, i32) {
    %c0_i32 = arith.constant 0 : i32
    %c0_i32_0 = arith.constant 0 : i32
    %c0_i32_1 = arith.constant 0 : i32
    return %arg0, %c0_i32, %c0_i32_0 : i32, i32, i32
  }
  func.func @transform_2(%arg0: i32, %arg1: i32) -> (i32, i32, i32) {
    %c0_i32 = arith.constant 0 : i32
    %c0_i32_0 = arith.constant 0 : i32
    return %arg0, %arg1, %c0_i32 : i32, i32, i32
  }
}

</mosaic_0001>

<bundles_post_ra>
// kernel: tpu_custom_call.1
= control target key start
LH: loop header
LB: loop body
LE: loop exit
PB: predicated region body
PF: predicated region fallthrough
CT: control target
= control target key end

     0   :  { %7 = vsyncpa [#allocation3], 0  ;;  %s941_s0 = inlined_call_operand.vmem [shape: bf16[56,32], index: 0, kind: input, shape index: {}]   ;;  %s942_s1 = inlined_call_operand.hbm [shape: bf16[3,32,128], index: 1, kind: input, shape index: {}]   ;;  %s943_s2 = inlined_call_operand.hbm [shape: bf16[3,56,128], index: 2, kind: output, shape index: {}]  }
   0x1   :  { %9 = vsyncpa [#allocation3 + $0x1], 0 }
   0x2   :  { %10 = vsyncpa [#allocation4], 0 }
   0x3   :  { %12 = vsyncpa [#allocation4 + $0x1], 0  ;;  %s755_s9 = smov 0   ;;  %s757_s10 = smov 0  }
   0x4   :  { %s759_s11 = smov 0   ;;  %s761_s12 = smov 0  }
   0x5   :  { %s763_s13 = smov 0   ;;  %s765_s14 = smov 0  }
   0x6 LB: > { %s469_s15 = sadd.s32 4294967295, %s732_s14   ;;  %s470_s16 = sadd.s32 4294967294, %s732_s14   ;;  %s732_s14 = sphi %s765_s14, %s18_s14   ;;  %s728_s13 = sphi %s763_s13, %s957_s13   ;;  %s724_s12 = sphi %s761_s12, %s956_s12   ;;  %s720_s11 = sphi %s759_s11, %s955_s11   ;;  %s716_s10 = sphi %s757_s10, %s954_s10   ;;  %s712_s9 = sphi %s755_s9, %s953_s9  }
   0x7   : > { %s30_s17 = sadd.s32 1, %s728_s13  ;;  %s63_s18 = sadd.s32 1, %s720_s11 }
   0x8   : > { %p32_p0 = scmp.ge.s32.totalorder %s30_s17, 3  ;;  %p70_p1 = scmp.ne.s32.totalorder %s720_s11, %s716_s10 }
   0x9   : > { %p71_p2 = scmp.eq.s32.totalorder %s732_s14, 0  ;;  %p76_p3 = scmp.ne.s32.totalorder %s716_s10, %s712_s9 }
   0xa   : > { %s959_s17 = smov (%p32_p0, %s30_s17), 0  ;;  %p77_p5 = scmp.eq.s32.totalorder %s469_s15, 0 }
   0xb   : > { %p796_p4 = por %p71_p2, %p70_p1  ;;  %s60_s20 = ssub.s32 %s728_s13, %s959_s17 }
   0xc   : > { %p102_p6 = scmp.eq.s32.totalorder %s469_s15, 2  ;;  %p61_p7 = scmp.eq.s32.totalorder %s60_s20, 0 }
   0xd   : > { %p802_p8 = por %p77_p5, %p76_p3  ;;  %p108_p10 = scmp.eq.s32.totalorder %s470_s16, 2 }
   0xe   : > { %p806_p9 = por %p102_p6, %p70_p1  ;;  %p560_p12 = scmp.lt.s32.totalorder %s732_s14, 3 }
   0xf   : > { %s811_s23 = scalar_select %p61_p7, %s720_s11, %s63_s18  }
  0x10   : > { %s947_s22 = scalar_select %p806_p9, 1, 0 }
  0x11   : > { %p813_p11 = por %p108_p10, %p76_p3  ;;  %s137_s25 = sand.u32 1, %s720_s11  }
  0x12   : > { %s474_s26 = sshll.u32 %s137_s25, 4  ;;  %s499_s27 = sshll.u32 %s728_s13, 8 }
  0x13   : > { %s948_s24 = scalar_select %p813_p11, 1, 0 }
  0x14   : > { %s823_s30 = scalar_lea.hbm %s942_s1, %s499_s27  ;;  %s141_s3 = scalar_lea.vmem [#allocation2], %s474_s26 }
  0x15   : > { %s148_s4 = sshll.u32 %s141_s3, 4  ;;  %p829_p13 = pnand %p560_p12, %p796_p4  ;;  %s825_s4 = int_to_ptr.vmem [resolvable:$true] %s148_s4 }
  0x16   : > { %s834_s6 = scalar_lea.sflag [#allocation3], %s137_s25  ;;  %s620_s7 = scalar_lea.hbm %s823_s30, 256 }
  0x17   : > { %p621_p1 = scmp.ne.s32.totalorder %s823_s30, %s620_s7  ;;  %p622_p2 = pneg %p829_p13 }
  0x18   : > { %s625_s16 = scalar_lea.hbm %s942_s1, 768  ;;  %p626_p4 = scmp.lt.u32.totalorder %s823_s30, %s942_s1 }
  0x19   : > { %p623_p3 = pnand %p622_p2, %p621_p1  ;;  %p627_p6 = scmp.lt.u32.totalorder %s625_s16, %s620_s7 }
  0x1a   : > { %p629_p10 = scmp.lt.u32.totalorder %s620_s7, %s823_s30 }
  0x1b   : > { %p624_p5 = pneg %p623_p3  ;;  %p628_p7 = por %p627_p6, %p626_p4 }
  0x1d   : > { %p630_p12 = por %p629_p10, %p628_p7 }
  0x1f   : > { %p631_p0 = pnand %p630_p12, %p624_p5 }
  0x21   : > { %634 = shalt.err (!%p631_p0)
}
  0x22   : > { %s635_s20 = scalar_lea.vmem %s825_s4, 256  ;;  %s734_s25 = smov [#allocation2]  }
  0x23   : > { %p636_p1 = scmp.ne.s32.totalorder %s825_s4, %s635_s20  ;;  %s640_s26 = sshll.u32 %s734_s25, 4  ;;  %s641_s26 = int_to_ptr.vmem [resolvable:$false] %s640_s26 }
  0x24   : > { %s642_s27 = scalar_lea.vmem %s641_s26, 512  ;;  %p643_p9 = scmp.lt.s32.totalorder %s825_s4, %s641_s26 }
  0x25   : > { %p638_p3 = pnand %p636_p1, %p622_p2  ;;  %p644_p4 = scmp.lt.s32.totalorder %s642_s27, %s635_s20 }
  0x27   : > { %p639_p11 = pneg %p638_p3  ;;  %p645_p6 = por %p644_p4, %p643_p9 }
  0x29   : > { %p646_p7 = pnand %p645_p6, %p639_p11 }
  0x2b   : > { %649 = shalt.err (!%p646_p7)
}
  0x2c   : > { %s735_s28 = smov 64   ;;  %s736_s29 = smov 4  }
  0x2d   : > { %555 = dma.hbm_to_vmem [thread:$0]  (!%p829_p13), %s823_s30, 256, %s825_s4, %s834_s6, %s735_s28, %s735_s28, %s736_s29  }
  0x2e   : > { %p156_p0 = scmp.lt.s32.totalorder %s732_s14, 4  ;;  %p950_p2 = scmp.ge.s32.totalorder %s732_s14, 1 }
  0x30   : > { %p157_p5 = pnand %p950_p2, %p156_p0 }
  0x31   : > { %s866_s3 = sand.u32 (!%p157_p5), 1, %s716_s10  }
  0x32   : > { %160 = sbr.rel (%p157_p5) target bundleno = 299 (0x12b), region = 28  ;;  %s478_s7 = sshll.u32 (!%p157_p5), %s866_s3, 4 }
  0x33   : > { %s163_s8 = scalar_lea.sflag (!%p157_p5), [#allocation3], %s866_s3  ;;  %s166_s15 = scalar_lea.vmem (!%p157_p5), [#allocation2], %s478_s7 }
  0x39   : > { %703 = dma.done.wait (%p802_p8), %s163_s8, 256  }
  0x3a   : > { %705 = vsyncadd (%p802_p8), %s163_s8, 4294967040  ;;  %v614_v0 = vld [vmem:[%s166_s15] sm:$0xff]   ;;  %v615_v1 = vld [vmem:[%s166_s15 + $0x8] sm:$0xff]   ;;  %vm241_vm0 = vcmask 261120   ;;  %s546_s20 = smul.u32 28, %s866_s3  ;;  %s355_s7 = scalar_lea.sflag [#allocation4], %s866_s3 }
  0x3b   : > { %530 = vmatprep.subr.bf16.mxu0 %v614_v0  ;;  %542 = vmatprep.subr.bf16.mxu1 %v614_v0  ;;  %v616_v2 = vld [vmem:[%s941_s0] sm:$0xff]   ;;  %v617_v3 = vld [vmem:[%s941_s0 + $0x10] sm:$0xff]   ;;  %v618_v4 = vld [vmem:[%s941_s0 + $0x8] sm:$0xff]   ;;  %s547_s27 = smul.u32 448, %s724_s12  ;;  %p951_p9 = scmp.ne.s32.totalorder %s947_s22, 0 }
  0x3c   : > { %531 = vmatpush3.bf16.msra.mxu0 %v614_v0  ;;  %544 = vmatpush3.bf16.msra.mxu1 %v614_v0  ;;  %v619_v5 = vld [vmem:[%s941_s0 + $0x18] ss:$0 sps:$4 sm:$0xff]   ;;  %s191_s25 = scalar_lea.vmem [#allocation5], %s546_s20  ;;  %s737_s15 = smov [#allocation5]  }
  0x3d   : > { %532 = vmatprep.subr.bf16.mxu0 %v615_v1  ;;  %543 = vmatprep.subr.bf16.mxu1 %v615_v1  ;;  %s370_s26 = sshll.u32 %s191_s25, 4  ;;  %s893_s12 = scalar_lea.hbm %s943_s2, %s547_s27  ;;  %s888_s26 = int_to_ptr.vmem [resolvable:$true] %s370_s26 }
  0x3e   : > { %534 = vmatprep.mubr.msk.bf16.mxu0 %vm241_vm0, %v616_v2  ;;  %538 = vmatprep.mubr.msk.bf16.mxu1 %vm241_vm0, %v617_v3  ;;  %s650_s8 = scalar_lea.vmem %s888_s26, 448  ;;  %s654_s30 = sshll.u32 %s737_s15, 4  ;;  %s655_s30 = int_to_ptr.vmem [resolvable:$false] %s654_s30 }
  0x3f   : > { %p651_p8 = scmp.ne.s32.totalorder %s888_s26, %s650_s8  ;;  %s656_s4 = scalar_lea.vmem %s655_s30, 896 }
  0x40   : > { %533 = vmatpush3.bf16.msra.mxu0 %v615_v1  ;;  %545 = vmatpush3.bf16.msra.mxu1 %v615_v1  ;;  %p657_p10 = scmp.lt.s32.totalorder %s888_s26, %s655_s30  ;;  %p658_p12 = scmp.lt.s32.totalorder %s656_s4, %s650_s8 }
  0x41   : > { %p652_p11 = pnand %p651_p8, %p951_p9 }
  0x42   : > { %p659_p1 = por %p658_p12, %p657_p10 }
  0x43   : > { %535 = vmatmul.mubr.msk.bf16.vlgmr.msra.gmra.mrb[0].mxu0 %vm241_vm0, %v618_v4  ;;  %539 = vmatmul.mubr.msk.bf16.vlgmr.msra.gmra.mrb[0].mxu1 %vm241_vm0, %v619_v5  ;;  %p653_p13 = pneg %p652_p11 }
  0x45   : > { %p660_p3 = pnand %p659_p1, %p653_p13 }
 0x116   : > { %v536_v6 = vpop.f32.mrb[0].mxu0  ;;  %v540_v7 = vpop.f32.mrb[0].mxu1 }
 0x117   : > { %v506_v8 = vpack.c.bf16 %v540_v7, %v540_v7  ;;  %v288_v9 = vpop.f32.mrb[1].mxu0  ;;  %v304_v10 = vpop.f32.mrb[1].mxu1 }
 0x118   : > { %v537_v11 = vpop.f32.mrb[2].mxu0  ;;  %v541_v12 = vpop.f32.mrb[2].mxu1 }
 0x119   : > { %353 = vst [vmem:[%s191_s25 + $0x18] sm:$0xf] %v506_v8  ;;  %v515_v13 = vpack.c.bf16 %v537_v11, %v536_v6  ;;  %v291_v14 = vpop.f32.mrb[3].mxu0  ;;  %v307_v15 = vpop.f32.mrb[3].mxu1 }
 0x11a   : > { %v510_v16 = vpack.c.bf16 %v291_v14, %v288_v9  ;;  %v520_v17 = vpack.c.bf16 %v307_v15, %v304_v10 }
 0x11b   : > { %522 = vst [vmem:[%s191_s25 + $0x8] sm:$0xff] %v515_v13  }
 0x11c   : > { %511 = vst [vmem:[%s191_s25] sm:$0xff] %v510_v16   ;;  %523 = vst [vmem:[%s191_s25 + $0x10] sm:$0xff] %v520_v17  }
 0x11d   : > { %663 = shalt.err (!%p660_p3)
}
 0x11e   : > { %s664_s5 = scalar_lea.hbm %s893_s12, 448  ;;  %s668_s16 = scalar_lea.hbm %s943_s2, 1344 }
 0x11f   : > { %p665_p4 = scmp.ne.s32.totalorder %s893_s12, %s664_s5  ;;  %p669_p0 = scmp.lt.u32.totalorder %s893_s12, %s943_s2 }
 0x120   : > { %p670_p2 = scmp.lt.u32.totalorder %s668_s16, %s664_s5  ;;  %p672_p8 = scmp.lt.u32.totalorder %s664_s5, %s893_s12 }
 0x121   : > { %p666_p6 = pnand %p665_p4, %p951_p9 }
 0x122   : > { %p671_p5 = por %p670_p2, %p669_p0 }
 0x123   : > { %p667_p7 = pneg %p666_p6 }
 0x124   : > { %p673_p11 = por %p672_p8, %p671_p5 }
 0x126   : > { %p674_p13 = pnand %p673_p11, %p667_p7 }
 0x128   : > { %677 = shalt.err (!%p674_p13)
}
 0x129   : > { %s738_s20 = smov 64   ;;  %s739_s25 = smov 4  }
 0x12a   : > { %550 = dma.vmem_to_hbm [thread:$0]  (%p951_p9), %s888_s26, 448, %s893_s12, %s355_s7, %s738_s20, %s738_s20, %s739_s25  }
 0x12b PF: > { %p561_p10 = scmp.ge.s32.totalorder %s732_s14, 2  ;;  %s385_s27 = sand.u32 1, %s712_s9  }
 0x12c   : > { %p952_p12 = scmp.ne.s32.totalorder %s948_s24, 0  ;;  %s386_s28 = scalar_lea.sflag [#allocation4], %s385_s27 }
 0x12e   : > { %p557_p1 = pnand %p561_p10, %p952_p12 }
 0x130   : > { %707 = dma.done.wait (!%p557_p1), %s386_s28, 448  }
 0x131   : > { %709 = vsyncadd (!%p557_p1), %s386_s28, 4294966848  ;;  %s18_s14 = sadd.s32 1, %s732_s14   ;;  %s953_s9 = smov %s716_s10 }
 0x132   : > { %p15_p3 = scmp.ge.s32.totalorder %s18_s14, 5   ;;  %s954_s10 = smov %s720_s11 }
 0x133   : > { %s955_s11 = smov %s811_s23  ;;  %s956_s12 = smov %s728_s13 }
 0x134   : > { %s957_s13 = smov %s959_s17  ;;  %17 = sbr.rel (!%p15_p3) target bundleno = 6 (0x6), region = 76 }
 0x13b   :  { %391 = vsyncpa [#allocation3], 1 }
 0x13c   :  { %393 = vsyncpa [#allocation3 + $0x1], 1 }
 0x13d   :  { %394 = vsyncpa [#allocation4], 1 }
 0x13e   :  { %396 = vsyncpa [#allocation4 + $0x1], 1 }

</bundles_post_ra>
